<compile_context>
chip_gen: v5e
topology: v5e:2x2
jax: 0.10.0
libtpu: 0.0.40
codegen_flags: <defaults>
</compile_context>

<pallas_src>
import functools

import jax
import jax.numpy as jnp
from jax.experimental import pallas as pl
from jax.experimental.pallas import tpu as pltpu


def _cross_attention_kernel(scale, b_real, nj,
                            x_ref, w_ref, bias_ref, o_ref, acc_ref, qkv_ref):
    p = pl.program_id(0)        # projection: 0 = query, 1 = key, 2 = value
    j = pl.program_id(1)        # hidden (output-feature) tile
    k = pl.program_id(2)        # inc (contraction) tile
    nk = pl.num_programs(2)
    b_pad, tn = acc_ref.shape

    # First contraction step of this (projection, hidden-tile): seed with bias.
    @pl.when(k == 0)
    def _():
        acc_ref[...] = jnp.broadcast_to(
            bias_ref[...].astype(jnp.float32), (b_pad, tn))

    # Accumulate the partial projection on the MXU (bf16 x bf16 -> f32).
    acc_ref[...] += jnp.dot(x_ref[...], w_ref[...],
                            preferred_element_type=jnp.float32)

    # Commit the finished (projection, hidden-tile) into the persistent q/k/v
    # scratch exactly once per tile (dynamic index only on the leading axis).
    @pl.when(k == nk - 1)
    def _():
        qkv_ref[p * nj + j] = acc_ref[...]

    # Attention epilogue once every projection tile has been accumulated
    # (the very last grid step). All scratch indices here are static.
    @pl.when((p == 2) & (j == nj - 1) & (k == nk - 1))
    def _():
        # scores = (q @ k.T) * sqrt(inc)   (module divides by p = 1/sqrt(inc))
        scores = jax.lax.dot_general(
            qkv_ref[0], qkv_ref[nj], (((1,), (1,)), ((), ())),
            preferred_element_type=jnp.float32)
        for jj in range(1, nj):
            scores += jax.lax.dot_general(
                qkv_ref[jj], qkv_ref[nj + jj], (((1,), (1,)), ((), ())),
                preferred_element_type=jnp.float32)
        scores = scores * scale
        # Mask padded batch columns out of the softmax.
        col_ids = jax.lax.broadcasted_iota(jnp.int32, scores.shape, 1)
        scores = jnp.where(col_ids < b_real, scores, -jnp.inf)
        m = jnp.max(scores, axis=-1, keepdims=True)
        e = jnp.exp(scores - m)
        attn = e * pl.reciprocal(jnp.sum(e, axis=-1, keepdims=True),
                                 approx=False)
        # out = attn @ v, written hidden-tile by hidden-tile (static slices).
        for jj in range(nj):
            o_ref[:, jj * tn:(jj + 1) * tn] = jnp.dot(
                attn, qkv_ref[2 * nj + jj],
                preferred_element_type=jnp.float32).astype(o_ref.dtype)


def _round_up(x, m):
    return (x + m - 1) // m * m


def _pick_tile(dim_pad, cap=512):
    """dim_pad is a multiple of 128; choose the largest tile <= cap dividing it."""
    if dim_pad <= cap:
        return dim_pad
    for t in (cap, 384, 256, 128):
        if dim_pad % t == 0:
            return t
    return 128


def cross_attention(query, key, value, params, *, compute_dtype=jnp.bfloat16):
    """Wrapper: flatten NCHW -> (b, inc), pad to TPU-friendly shapes, pre-
    transpose + bf16-cast the weights, then run a single tiled pallas_call."""
    b, c, h, w = query.shape
    inc = c * h * w
    hidden, inc_w = params["w1"].shape
    assert inc_w == inc, (inc_w, inc)
    scale = float(inc) ** 0.5            # == 1 / p, p = 1 / sqrt(inc)

    b_pad = max(16, _round_up(b, 16))           # sublane-friendly for bf16
    inc_pad = _round_up(inc, 128)               # lane-dense contraction dim
    hidden_pad = _round_up(hidden, 128)         # lane-dense output dim
    tk = _pick_tile(inc_pad)
    tn = _pick_tile(hidden_pad)
    nj = hidden_pad // tn
    nk = inc_pad // tk

    def pad_x(x):
        x2 = x.reshape(b, -1)
        return jnp.pad(x2, ((0, b_pad - b), (0, inc_pad - inc))).astype(compute_dtype)

    X = jnp.stack([pad_x(query), pad_x(key), pad_x(value)])          # (3, b_pad, inc_pad)

    def pad_w(wm):
        wt = wm.T                                                     # (inc, hidden)
        return jnp.pad(wt, ((0, inc_pad - inc),
                            (0, hidden_pad - hidden))).astype(compute_dtype)

    W = jnp.stack([pad_w(params["w1"]), pad_w(params["w2"]), pad_w(params["w3"])])

    def pad_b(bv):
        return jnp.pad(bv.reshape(1, -1),
                       ((0, 0), (0, hidden_pad - hidden))).astype(jnp.float32)

    Bias = jnp.stack([pad_b(params["b1"]), pad_b(params["b2"]), pad_b(params["b3"])])

    grid = (3, nj, nk)

    itemsize = jnp.dtype(compute_dtype).itemsize
    vmem_need = (2 * (b_pad * tk + tk * tn) * itemsize   # double-buffered input/weight tiles
                 + 2 * tn * 4                            # bias tiles
                 + b_pad * tn * 4                        # per-tile f32 accumulator
                 + 3 * b_pad * hidden_pad * 4            # q/k/v f32 scratch
                 + 2 * b_pad * hidden_pad * 4)           # output block
    vmem_limit = int(min(max(16 << 20, 2 * vmem_need), 48 << 20))

    out_pad = pl.pallas_call(
        functools.partial(_cross_attention_kernel, scale, b, nj),
        out_shape=jax.ShapeDtypeStruct((b_pad, hidden_pad), jnp.float32),
        grid_spec=pltpu.PrefetchScalarGridSpec(
            num_scalar_prefetch=0,
            grid=grid,
            in_specs=[
                # x: (3, b_pad, inc_pad) -> kernel sees (b_pad, tk)
                pl.BlockSpec((pl.Squeezed(), b_pad, tk), lambda p, j, k: (p, 0, k)),
                # W^T: (3, inc_pad, hidden_pad) -> kernel sees (tk, tn)
                pl.BlockSpec((pl.Squeezed(), tk, tn), lambda p, j, k: (p, k, j)),
                # bias: (3, 1, hidden_pad) -> kernel sees (1, tn)
                pl.BlockSpec((pl.Squeezed(), 1, tn), lambda p, j, k: (p, 0, j)),
            ],
            # Output block is resident across the whole grid; written once in
            # the epilogue at the final step.
            out_specs=pl.BlockSpec((b_pad, hidden_pad), lambda p, j, k: (0, 0)),
            scratch_shapes=[
                pltpu.VMEM((b_pad, tn), jnp.float32),            # tile accumulator
                pltpu.VMEM((3 * nj, b_pad, tn), jnp.float32),    # q/k/v projections
            ],
        ),
        compiler_params=pltpu.CompilerParams(
            # All axes carry the q/k/v accumulator + epilogue dependency.
            dimension_semantics=("arbitrary", "arbitrary", "arbitrary"),
            vmem_limit_bytes=vmem_limit,
        ),
    )(X, W, Bias)

    return out_pad[:b, :hidden]


def reference(query, key, value, params, compute_dtype=jnp.float32):
    """Pure-JAX reference matching the PyTorch forward. compute_dtype mirrors
    the kernel's bf16 rounding of inputs/weights (f32 accumulation kept)."""
    b = query.shape[0]
    inc = params["w1"].shape[1]

    def flat(x):
        return x.reshape(b, -1).astype(compute_dtype)

    def wt(wm):
        return wm.T.astype(compute_dtype)

    q = jnp.dot(flat(query), wt(params["w1"]),
                preferred_element_type=jnp.float32) + params["b1"]
    k = jnp.dot(flat(key), wt(params["w2"]),
                preferred_element_type=jnp.float32) + params["b2"]
    v = jnp.dot(flat(value), wt(params["w3"]),
                preferred_element_type=jnp.float32) + params["b3"]
    scores = (q @ k.T) * (float(inc) ** 0.5)
    attn = jax.nn.softmax(scores, axis=-1)
    return attn @ v


if __name__ == "__main__":
    # Small shapes consistent with the module: inc must equal c*h*w, hidden == inc.
    b, c, h, w = 2, 4, 8, 8
    inc = c * h * w            # 256
    hidden = inc

    root = jax.random.PRNGKey(0)
    ks = jax.random.split(root, 9)

    bound = 1.0 / (inc ** 0.5)
    params = {
        "w1": jax.random.uniform(ks[0], (hidden, inc), jnp.float32, -bound, bound),
        "b1": jax.random.uniform(ks[1], (hidden,), jnp.float32, -bound, bound),
        "w2": jax.random.uniform(ks[2], (hidden, inc), jnp.float32, -bound, bound),
        "b2": jax.random.uniform(ks[3], (hidden,), jnp.float32, -bound, bound),
        "w3": jax.random.uniform(ks[4], (hidden, inc), jnp.float32, -bound, bound),
        "b3": jax.random.uniform(ks[5], (hidden,), jnp.float32, -bound, bound),
    }

    query = jax.random.normal(ks[6], (b, c, h, w), jnp.float32)
    key = jax.random.normal(ks[7], (b, c, h, w), jnp.float32)
    value = jax.random.normal(ks[8], (b, c, h, w), jnp.float32)

    out = jax.block_until_ready(cross_attention(query, key, value, params))
    assert out.shape == (b, hidden), out.shape

    # Matched-precision reference (same bf16 rounding of x / W, f32 accumulate)
    # so the check is deterministic; differences are only accumulation order.
    ref = reference(query, key, value, params, compute_dtype=jnp.bfloat16)
    max_err = float(jnp.max(jnp.abs(out - ref)))
    assert jnp.allclose(out, ref, rtol=2e-3, atol=2e-3), max_err

    print("KERNEL_OK")
</pallas_src>

<mosaic_0001>
module attributes {stable_mosaic.version = 11 : i64} {
  func.func @_cross_attention_kernel(%arg0: i32, %arg1: i32, %arg2: i32, %arg3: memref<1x16x256xbf16, #tpu.memory_space<vmem>>, %arg4: memref<1x256x256xbf16, #tpu.memory_space<vmem>>, %arg5: memref<1x1x256xf32, #tpu.memory_space<vmem>>, %arg6: memref<16x256xf32, #tpu.memory_space<vmem>>, %arg7: memref<16x256xf32, #tpu.memory_space<vmem>>, %arg8: memref<3x16x256xf32, #tpu.memory_space<vmem>>) attributes {dimension_semantics = [#tpu.dimension_semantics<arbitrary>, #tpu.dimension_semantics<arbitrary>, #tpu.dimension_semantics<arbitrary>], iteration_bounds = array<i64: 3, 1, 1>, scalar_prefetch = 0 : i64, scratch_operands = 2 : i64, tpu.core_type = #tpu.core_type<tc>, window_params = [{transform_indices = @transform_0, window_bounds = array<i64: 1, 16, 256>}, {transform_indices = @transform_1, window_bounds = array<i64: 1, 256, 256>}, {transform_indices = @transform_2, window_bounds = array<i64: 1, 1, 256>}, {pipeline_mode = #tpu.pipeline_mode<synchronous>, transform_indices = @transform_3, window_bounds = array<i64: 16, 256>}]} {
    %c0_i32 = arith.constant 0 : i32
    %0 = arith.cmpi eq, %arg2, %c0_i32 : i32
    %1 = arith.extui %0 : i1 to i32
    %c0_i32_0 = arith.constant 0 : i32
    %2 = arith.cmpi ne, %1, %c0_i32_0 : i32
    scf.if %2 {
      %c0_15 = arith.constant 0 : index
      %c0_16 = arith.constant 0 : index
      %c0_17 = arith.constant 0 : index
      %21 = vector.load %arg5[%c0_15, %c0_16, %c0_17] : memref<1x1x256xf32, #tpu.memory_space<vmem>>, vector<1x1x256xf32>
      %22 = vector.shape_cast %21 : vector<1x1x256xf32> to vector<1x256xf32>
      %23 = vector.shape_cast %22 : vector<1x256xf32> to vector<1x256xf32>
      %24 = vector.broadcast %23 : vector<1x256xf32> to vector<16x256xf32>
      %c0_18 = arith.constant 0 : index
      %c0_19 = arith.constant 0 : index
      %25 = vector.load %arg7[%c0_18, %c0_19] : memref<16x256xf32, #tpu.memory_space<vmem>>, vector<16x256xf32>
      tpu.vector_store %arg7[%c0_18, %c0_19], %24 {strides = array<i32>} : memref<16x256xf32, #tpu.memory_space<vmem>>, vector<16x256xf32>,
    } else {
    }
    %c0 = arith.constant 0 : index
    %c0_1 = arith.constant 0 : index
    %3 = vector.load %arg7[%c0, %c0_1] : memref<16x256xf32, #tpu.memory_space<vmem>>, vector<16x256xf32>
    %c0_2 = arith.constant 0 : index
    %c0_3 = arith.constant 0 : index
    %c0_4 = arith.constant 0 : index
    %4 = vector.load %arg3[%c0_2, %c0_3, %c0_4] : memref<1x16x256xbf16, #tpu.memory_space<vmem>>, vector<1x16x256xbf16>
    %5 = vector.shape_cast %4 : vector<1x16x256xbf16> to vector<16x256xbf16>
    %c0_5 = arith.constant 0 : index
    %c0_6 = arith.constant 0 : index
    %c0_7 = arith.constant 0 : index
    %6 = vector.load %arg4[%c0_5, %c0_6, %c0_7] : memref<1x256x256xbf16, #tpu.memory_space<vmem>>, vector<1x256x256xbf16>
    %7 = vector.shape_cast %6 : vector<1x256x256xbf16> to vector<256x256xbf16>
    %cst = arith.constant dense<0.000000e+00> : vector<16x256xf32>
    %8 = tpu.matmul %5, %7, %cst {dimension_numbers = #tpu.dot_dimension_numbers<[1], [0], [0], [1], [0, 0, 1, 1], [], []>} : vector<16x256xbf16>, vector<256x256xbf16>, vector<16x256xf32> -> vector<16x256xf32>
    %9 = arith.addf %3, %8 : vector<16x256xf32>
    %c0_8 = arith.constant 0 : index
    %c0_9 = arith.constant 0 : index
    %10 = vector.load %arg7[%c0_8, %c0_9] : memref<16x256xf32, #tpu.memory_space<vmem>>, vector<16x256xf32>
    tpu.vector_store %arg7[%c0_8, %c0_9], %9 {strides = array<i32>} : memref<16x256xf32, #tpu.memory_space<vmem>>, vector<16x256xf32>,
    %c0_i32_10 = arith.constant 0 : i32
    %11 = arith.cmpi eq, %arg2, %c0_i32_10 : i32
    %12 = arith.extui %11 : i1 to i32
    %c0_i32_11 = arith.constant 0 : i32
    %13 = arith.cmpi ne, %12, %c0_i32_11 : i32
    scf.if %13 {
      %c0_15 = arith.constant 0 : index
      %c0_16 = arith.constant 0 : index
      %21 = vector.load %arg7[%c0_15, %c0_16] : memref<16x256xf32, #tpu.memory_space<vmem>>, vector<16x256xf32>
      %c1_i32 = arith.constant 1 : i32
      %22 = arith.muli %arg0, %c1_i32 : i32
      %23 = arith.addi %22, %arg1 : i32
      %24 = arith.index_cast %23 : i32 to index
      %c0_17 = arith.constant 0 : index
      %c0_18 = arith.constant 0 : index
      %25 = vector.load %arg8[%24, %c0_17, %c0_18] : memref<3x16x256xf32, #tpu.memory_space<vmem>>, vector<1x16x256xf32>
      %26 = vector.shape_cast %25 : vector<1x16x256xf32> to vector<16x256xf32>
      %27 = vector.shape_cast %21 : vector<16x256xf32> to vector<1x16x256xf32>
      tpu.vector_store %arg8[%24, %c0_17, %c0_18], %27 {strides = array<i32>} : memref<3x16x256xf32, #tpu.memory_space<vmem>>, vector<1x16x256xf32>,
    } else {
    }
    %c2_i32 = arith.constant 2 : i32
    %14 = arith.cmpi eq, %arg0, %c2_i32 : i32
    %c0_i32_12 = arith.constant 0 : i32
    %15 = arith.cmpi eq, %arg1, %c0_i32_12 : i32
    %16 = arith.andi %14, %15 : i1
    %c0_i32_13 = arith.constant 0 : i32
    %17 = arith.cmpi eq, %arg2, %c0_i32_13 : i32
    %18 = arith.andi %16, %17 : i1
    %19 = arith.extui %18 : i1 to i32
    %c0_i32_14 = arith.constant 0 : i32
    %20 = arith.cmpi ne, %19, %c0_i32_14 : i32
    scf.if %20 {
      %c0_15 = arith.constant 0 : index
      %c0_16 = arith.constant 0 : index
      %c0_17 = arith.constant 0 : index
      %21 = vector.load %arg8[%c0_15, %c0_16, %c0_17] : memref<3x16x256xf32, #tpu.memory_space<vmem>>, vector<1x16x256xf32>
      %22 = vector.shape_cast %21 : vector<1x16x256xf32> to vector<16x256xf32>
      %c1 = arith.constant 1 : index
      %c0_18 = arith.constant 0 : index
      %c0_19 = arith.constant 0 : index
      %23 = vector.load %arg8[%c1, %c0_18, %c0_19] : memref<3x16x256xf32, #tpu.memory_space<vmem>>, vector<1x16x256xf32>
      %24 = vector.shape_cast %23 : vector<1x16x256xf32> to vector<16x256xf32>
      %cst_20 = arith.constant dense<0.000000e+00> : vector<16x16xf32>
      %25 = tpu.matmul %22, %24, %cst_20 {dimension_numbers = #tpu.dot_dimension_numbers<[1], [1], [0], [0], [0, 0, 1, 0], [], []>} : vector<16x256xf32>, vector<16x256xf32>, vector<16x16xf32> -> vector<16x16xf32>
      %cst_21 = arith.constant 1.600000e+01 : f32
      %26 = vector.broadcast %cst_21 : f32 to vector<16x16xf32>
      %27 = arith.mulf %25, %26 : vector<16x16xf32>
      %28 = tpu.iota {dimensions = array<i32: 1>} : vector<16x16xi32>
      %c2_i32_22 = arith.constant 2 : i32
      %29 = vector.broadcast %c2_i32_22 : i32 to vector<16x16xi32>
      %30 = arith.cmpi slt, %28, %29 : vector<16x16xi32>
      %cst_23 = arith.constant 0xFF800000 : f32
      %31 = vector.broadcast %cst_23 : f32 to vector<16x16xf32>
      %32 = arith.select %30, %27, %31 : vector<16x16xi1>, vector<16x16xf32>
      %cst_24 = arith.constant dense<0xFF800000> : vector<16xf32>
      %33 = vector.multi_reduction <maximumf>, %32, %cst_24 [1] : vector<16x16xf32> to vector<16xf32>
      %34 = vector.shape_cast %33 : vector<16xf32> to vector<16x1xf32>
      %35 = vector.broadcast %34 : vector<16x1xf32> to vector<16x16xf32>
      %36 = arith.subf %32, %35 : vector<16x16xf32>
      %37 = math.exp %36 : vector<16x16xf32>
      %cst_25 = arith.constant dense<0.000000e+00> : vector<16xf32>
      %38 = vector.multi_reduction <add>, %37, %cst_25 [1] : vector<16x16xf32> to vector<16xf32>
      %39 = vector.shape_cast %38 : vector<16xf32> to vector<16x1xf32>
      %40 = tpu.reciprocal %39 : vector<16x1xf32> -> vector<16x1xf32>
      %41 = vector.broadcast %40 : vector<16x1xf32> to vector<16x16xf32>
      %42 = arith.mulf %37, %41 : vector<16x16xf32>
      %c2 = arith.constant 2 : index
      %c0_26 = arith.constant 0 : index
      %c0_27 = arith.constant 0 : index
      %43 = vector.load %arg8[%c2, %c0_26, %c0_27] : memref<3x16x256xf32, #tpu.memory_space<vmem>>, vector<1x16x256xf32>
      %44 = vector.shape_cast %43 : vector<1x16x256xf32> to vector<16x256xf32>
      %cst_28 = arith.constant dense<0.000000e+00> : vector<16x256xf32>
      %45 = tpu.matmul %42, %44, %cst_28 {dimension_numbers = #tpu.dot_dimension_numbers<[1], [0], [0], [1], [0, 0, 1, 1], [], []>} : vector<16x16xf32>, vector<16x256xf32>, vector<16x256xf32> -> vector<16x256xf32>
      %c0_29 = arith.constant 0 : index
      %c0_30 = arith.constant 0 : index
      %46 = vector.load %arg6[%c0_29, %c0_30] : memref<16x256xf32, #tpu.memory_space<vmem>>, vector<16x256xf32>
      tpu.vector_store %arg6[%c0_29, %c0_30], %45 {strides = array<i32>} : memref<16x256xf32, #tpu.memory_space<vmem>>, vector<16x256xf32>,
    } else {
    }
    return
  }
  func.func @transform_0(%arg0: i32, %arg1: i32, %arg2: i32) -> (i32, i32, i32) {
    %c0_i32 = arith.constant 0 : i32
    %c0_i32_0 = arith.constant 0 : i32
    return %arg0, %c0_i32, %arg2 : i32, i32, i32
  }
  func.func @transform_1(%arg0: i32, %arg1: i32, %arg2: i32) -> (i32, i32, i32) {
    %c0_i32 = arith.constant 0 : i32
    return %arg0, %arg2, %arg1 : i32, i32, i32
  }
  func.func @transform_2(%arg0: i32, %arg1: i32, %arg2: i32) -> (i32, i32, i32) {
    %c0_i32 = arith.constant 0 : i32
    %c0_i32_0 = arith.constant 0 : i32
    return %arg0, %c0_i32, %arg1 : i32, i32, i32
  }
  func.func @transform_3(%arg0: i32, %arg1: i32, %arg2: i32) -> (i32, i32) {
    %c0_i32 = arith.constant 0 : i32
    %c0_i32_0 = arith.constant 0 : i32
    %c0_i32_1 = arith.constant 0 : i32
    return %c0_i32, %c0_i32_0 : i32, i32
  }
}

</mosaic_0001>

<bundles_post_ra>
// kernel: tpu_custom_call.1
= control target key start
LH: loop header
LB: loop body
LE: loop exit
PB: predicated region body
PF: predicated region fallthrough
CT: control target
= control target key end

     0   :  { %s1606_s0 = inlined_call_operand.hbm [shape: bf16[3,16,256], index: 0, kind: input, shape index: {}]   ;;  %s1607_s1 = inlined_call_operand.hbm [shape: bf16[3,256,256], index: 1, kind: input, shape index: {}]   ;;  %s1608_s2 = inlined_call_operand.hbm [shape: f32[3,1,256], index: 2, kind: input, shape index: {}]   ;;  %s1609_s3 = inlined_call_operand.hbm [shape: f32[16,256], index: 3, kind: output, shape index: {}]  }
   0x1   :  { %1613 = sst [smem:[#allocation18_spill]] %s1607_s1 }
   0x2   :  { %8 = vsyncpa [#allocation5], 0 }
   0x3   :  { %10 = vsyncpa [#allocation5 + $0x1], 0 }
   0x4   :  { %11 = vsyncpa [#allocation8], 0 }
   0x5   :  { %13 = vsyncpa [#allocation8 + $0x1], 0 }
   0x6   :  { %14 = vsyncpa [#allocation6], 0  ;;  %s1396_s12 = smov 0   ;;  %s1398_s13 = smov 0  }
   0x7   :  { %s1400_s14 = smov 0   ;;  %s1402_s15 = smov 0  }
   0x8   :  { %s1404_s16 = smov 0   ;;  %s1406_s17 = smov 0  }
   0x9 LB: > { %1614 = sst [smem:[#allocation14_spill]] %s1357_s14  ;;  %s1425_s18 = sadd.s32 4294967295, %s1369_s17   ;;  %s1369_s17 = sphi %s1406_s17, %s20_s17   ;;  %s1365_s16 = sphi %s1404_s16, %s1629_s16   ;;  %s1361_s15 = sphi %s1402_s15, %s1628_s15   ;;  %s1357_s14 = sphi %s1400_s14, %s1624_s14   ;;  %s1353_s13 = sphi %s1398_s13, %s1627_s13   ;;  %s1349_s12 = sphi %s1396_s12, %s1626_s12  }
   0xa   : > { %1615 = sst [smem:[#allocation15_spill]] %s1369_s17  ;;  %s39_s19 = sadd.s32 1, %s1365_s16 }
   0xb   : > { %p41_p0 = scmp.ge.s32.totalorder %s39_s19, 3  ;;  %s48_s20 = sadd.s32 1, %s1357_s14 }
   0xc   : > { %p55_p1 = scmp.ne.s32.totalorder %s1357_s14, %s1353_s13  ;;  %p56_p2 = scmp.eq.s32.totalorder %s1369_s17, 0 }
   0xd   : > { %s1631_s19 = smov (%p41_p0, %s39_s19), 0  ;;  %p61_p4 = scmp.ne.s32.totalorder %s1353_s13, %s1349_s12 }
   0xe   : > { %1616 = sst [smem:[#allocation16_spill]] %s1631_s19  ;;  %p57_p3 = por %p56_p2, %p55_p1 }
   0xf   : > { %s43_s21 = ssub.s32 %s1365_s16, %s1631_s19  ;;  %p62_p5 = scmp.eq.s32.totalorder %s1425_s18, 0 }
  0x10   : > { %p46_p6 = scmp.eq.s32.totalorder %s43_s21, 0  ;;  %p1129_p8 = scmp.lt.s32.totalorder %s1369_s17, 3 }
  0x11   : > { %p1438_p7 = por %p62_p5, %p61_p4  ;;  %s1447_s24 = sand.u32 1, %s1357_s14  }
  0x12   : > { %s1444_s23 = scalar_select %p46_p6, %s1357_s14, %s48_s20  }
  0x13   : > { %p1449_p9 = pnand %p1129_p8, %p57_p3  ;;  %s188_s26 = sand.u32 1, %s1369_s17  }
  0x14   : > { %1618 = sst [smem:[#allocation17_spill]] %s1444_s23  ;;  %s913_s27 = sshll.u32 %s1447_s24, 8 }
  0x15   : > { %s1071_s28 = sshll.u32 %s1365_s16, 8  ;;  %s1620_s1 = sld [smem:[#allocation18_spill]] }
  0x16   : > { %s192_s5 = scalar_lea.vmem [#allocation7], %s913_s27  ;;  %p918_p10 = scmp.ge.s32.totalorder %s1369_s17, 1 }
  0x17   : > { %s205_s6 = sshll.u32 %s192_s5, 4  ;;  %s189_s8 = scalar_lea.sflag [#allocation8], %s188_s26  ;;  %s206_s6 = int_to_ptr.vmem [resolvable:$true] %s205_s6 }
  0x18   : > { %s1371_s9 = smov 128   ;;  %s1372_s10 = smov 8  }
  0x19   : > { %p234_p11 = scmp.lt.s32.totalorder %s1369_s17, 4  ;;  %s910_s12 = sshll.u32 %s1447_s24, 4 }
  0x1a   : > { %s1070_s20 = sshll.u32 %s1365_s16, 4  ;;  %s168_s29 = scalar_lea.vmem [#allocation4], %s910_s12 }
  0x1b   : > { %s202_s4 = scalar_lea.hbm %s1620_s1, %s1071_s28  ;;  %p1463_p12 = pnand %p918_p10, %p234_p11 }
  0x1c   : > { %s203_s7 = sshll.u32 %s202_s4, 4  ;;  %s175_s28 = scalar_lea.hbm %s1606_s0, %s1070_s20  ;;  %s204_s7 = int_to_ptr.hbm [resolvable:$true] %s203_s7 }
  0x1d   : > { %1125 = dma.hbm_to_vmem [thread:$0]  (!%p1449_p9), %s204_s7, 4096, %s206_s6, %s189_s8, %s1371_s9, %s1371_s9, %s1372_s10  }
  0x1e   : > { %s178_s26 = sshll.u32 %s168_s29, 4  ;;  %s176_s30 = sshll.u32 %s175_s28, 4  ;;  %s179_s26 = int_to_ptr.vmem [resolvable:$true] %s178_s26  ;;  %s177_s30 = int_to_ptr.hbm [resolvable:$true] %s176_s30 }
  0x1f   : > { %s916_s4 = sshll.u32 %s1447_s24, 1  ;;  %s165_s5 = scalar_lea.sflag [#allocation5], %s1447_s24 }
  0x20   : > { %1122 = dma.hbm_to_vmem [thread:$0]  (!%p1449_p9), %s177_s30, 256, %s179_s26, %s165_s5, %s1371_s9, %s1371_s9, %s1372_s10  }
  0x21   : > { %s917_s6 = sshll.u32 %s1365_s16, 1  ;;  %s219_s23 = scalar_lea.vmem [#allocation9], %s916_s4 }
  0x22   : > { %s225_s19 = scalar_lea.hbm %s1608_s2, %s917_s6  ;;  %s229_s14 = sshll.u32 %s219_s23, 4  ;;  %s230_s14 = int_to_ptr.vmem [resolvable:$true] %s229_s14 }
  0x23   : > { %s227_s17 = sshll.u32 %s225_s19, 4  ;;  %238 = sbr.rel (%p1463_p12) target bundleno = 783 (0x30f), region = 32  ;;  %s228_s17 = int_to_ptr.hbm [resolvable:$true] %s227_s17 }
  0x24   : > { %1128 = dma.hbm_to_vmem [thread:$0]  (!%p1449_p9), %s228_s17, 32, %s230_s14, %s189_s8  }
  0x25   : > { %s1485_s24 = sand.u32 (!%p1463_p12), 1, %s1353_s13  }
  0x26   : > { %s919_s9 = sshll.u32 (!%p1463_p12), %s1485_s24, 4  ;;  %s241_s10 = scalar_lea.sflag (!%p1463_p12), [#allocation5], %s1485_s24 }
  0x27   : > { %s1489_s1 = scalar_lea.vmem (!%p1463_p12), [#allocation4], %s919_s9 }
  0x28   : > { %1336 = dma.done.wait (%p1438_p7), %s241_s10, 256  }
  0x29   : > { %1338 = vsyncadd (%p1438_p7), %s241_s10, 4294967040  ;;  %s250_s14 = sand.u32 1, %s1425_s18   ;;  %s920_s17 = sshll.u32 %s1485_s24, 8 }
  0x2a   : > { %s251_s19 = scalar_lea.sflag [#allocation8], %s250_s14  ;;  %s1497_s23 = scalar_lea.vmem [#allocation7], %s920_s17 }
  0x2b   : > { %1340 = dma.done.wait (%p1438_p7), %s251_s19, 4128  }
  0x2c   : > { %1342 = vsyncadd (%p1438_p7), %s251_s19, 4294963168  ;;  %v988_v0 = vld [vmem:[%s1497_s23 + $0x70] sm:$0xf]  ;;  %v1089_v1 = vld [vmem:[%s1497_s23 + $0x74] sm:$0xf0]  ;;  %p598_p13 = scmp.eq.s32.totalorder %s1361_s15, 2 }
  0x2d   : > { %v1052_v2 = vld [vmem:[%s1497_s23 + $0xf0] sm:$0xf]  ;;  %v989_v3 = vor.u32 %v1089_v1, %v988_v0  ;;  %v1105_v4 = vld [vmem:[%s1497_s23 + $0xf4] sm:$0xf0]  ;;  %v1088_v5 = vld [vmem:[%s1497_s23 + $0x74] sm:$0xf] }
  0x2e   : > { %v990_v6 = vld [vmem:[%s1497_s23 + $0x78] sm:$0xf0]  ;;  %v1053_v7 = vor.u32 %v1105_v4, %v1052_v2  ;;  %v1104_v9 = vld [vmem:[%s1497_s23 + $0xf4] sm:$0xf]  ;;  %v980_v11 = vld [vmem:[%s1497_s23 + $0x60] sm:$0xf] }
  0x2f   : > { %v993_v8 = vor.u32 %v1088_v5, %v990_v6  ;;  %v1054_v10 = vld [vmem:[%s1497_s23 + $0xf8] sm:$0xf0]  ;;  %519 = vmatpush.bf16.msra.mxu0 %v989_v3  ;;  %v1087_v13 = vld [vmem:[%s1497_s23 + $0x64] sm:$0xf0]  ;;  %v1044_v14 = vld [vmem:[%s1497_s23 + $0xe0] sm:$0xf] }
  0x30   : > { %v1057_v12 = vor.u32 %v1104_v9, %v1054_v10  ;;  %v1103_v15 = vld [vmem:[%s1497_s23 + $0xe4] sm:$0xf0]  ;;  %533 = vmatpush.bf16.msra.mxu1 %v1053_v7  ;;  %v981_v16 = vor.u32 %v1087_v13, %v980_v11  ;;  %v1086_v18 = vld [vmem:[%s1497_s23 + $0x64] sm:$0xf]  ;;  %v982_v19 = vld [vmem:[%s1497_s23 + $0x68] sm:$0xf0] }
  0x31   : > { %547 = vmatpush.bf16.msra.mxu2 %v993_v8  ;;  %v1045_v17 = vor.u32 %v1103_v15, %v1044_v14  ;;  %v1102_v20 = vld [vmem:[%s1497_s23 + $0xe4] sm:$0xf]  ;;  %v985_v21 = vor.u32 %v1086_v18, %v982_v19  ;;  %v1046_v22 = vld [vmem:[%s1497_s23 + $0xe8] sm:$0xf0]  ;;  %v972_v23 = vld [vmem:[%s1497_s23 + $0x50] sm:$0xf] }
  0x32   : > { %561 = vmatpush.bf16.msra.mxu3 %v1057_v12  ;;  %v1085_v24 = vld [vmem:[%s1497_s23 + $0x54] sm:$0xf0]  ;;  %v1049_v25 = vor.u32 %v1102_v20, %v1046_v22  ;;  %v1036_v26 = vld [vmem:[%s1497_s23 + $0xd0] sm:$0xf]  ;;  %v1084_v28 = vld [vmem:[%s1497_s23 + $0x54] sm:$0xf] }
  0x33   : > { %v1101_v27 = vld [vmem:[%s1497_s23 + $0xd4] sm:$0xf0]  ;;  %520 = vmatpush.bf16.msra.mxu0 %v981_v16  ;;  %v973_v29 = vor.u32 %v1085_v24, %v972_v23  ;;  %v974_v30 = vld [vmem:[%s1497_s23 + $0x58] sm:$0xf0]  ;;  %v1100_v31 = vld [vmem:[%s1497_s23 + $0xd4] sm:$0xf] }
  0x34   : > { %v1038_v32 = vld [vmem:[%s1497_s23 + $0xd8] sm:$0xf0]  ;;  %534 = vmatpush.bf16.msra.mxu1 %v1045_v17  ;;  %v1037_v33 = vor.u32 %v1101_v27, %v1036_v26  ;;  %v977_v34 = vor.u32 %v1084_v28, %v974_v30  ;;  %v964_v35 = vld [vmem:[%s1497_s23 + $0x40] sm:$0xf]  ;;  %v1083_v36 = vld [vmem:[%s1497_s23 + $0x44] sm:$0xf0] }
  0x35   : > { %548 = vmatpush.bf16.msra.mxu2 %v985_v21  ;;  %v1028_v37 = vld [vmem:[%s1497_s23 + $0xc0] sm:$0xf]  ;;  %v1041_v38 = vor.u32 %v1100_v31, %v1038_v32  ;;  %v1099_v39 = vld [vmem:[%s1497_s23 + $0xc4] sm:$0xf0]  ;;  %v1082_v40 = vld [vmem:[%s1497_s23 + $0x44] sm:$0xf]  ;;  %v965_v44 = vor.u32 %v1083_v36, %v964_v35 }
  0x36   : > { %562 = vmatpush.bf16.msra.mxu3 %v1049_v25  ;;  %v966_v41 = vld [vmem:[%s1497_s23 + $0x48] sm:$0xf0]  ;;  %v1098_v42 = vld [vmem:[%s1497_s23 + $0xc4] sm:$0xf]  ;;  %v1029_v45 = vor.u32 %v1099_v39, %v1028_v37  ;;  %v956_v47 = vld [vmem:[%s1497_s23 + $0x30] sm:$0xf] }
  0x37   : > { %v1030_v43 = vld [vmem:[%s1497_s23 + $0xc8] sm:$0xf0]  ;;  %521 = vmatpush.bf16.msra.mxu0 %v973_v29  ;;  %v969_v46 = vor.u32 %v1082_v40, %v966_v41  ;;  %v1081_v48 = vld [vmem:[%s1497_s23 + $0x34] sm:$0xf0]  ;;  %v1020_v49 = vld [vmem:[%s1497_s23 + $0xb0] sm:$0xf] }
  0x38   : > { %535 = vmatpush.bf16.msra.mxu1 %v1037_v33  ;;  %v1033_v50 = vor.u32 %v1098_v42, %v1030_v43  ;;  %v1097_v51 = vld [vmem:[%s1497_s23 + $0xb4] sm:$0xf0]  ;;  %v1080_v52 = vld [vmem:[%s1497_s23 + $0x34] sm:$0xf]  ;;  %v958_v53 = vld [vmem:[%s1497_s23 + $0x38] sm:$0xf0]  ;;  %v957_v56 = vor.u32 %v1081_v48, %v956_v47 }
  0x39   : > { %549 = vmatpush.bf16.msra.mxu2 %v977_v34  ;;  %v1096_v54 = vld [vmem:[%s1497_s23 + $0xb4] sm:$0xf]  ;;  %v1022_v55 = vld [vmem:[%s1497_s23 + $0xb8] sm:$0xf0]  ;;  %v1021_v57 = vor.u32 %v1097_v51, %v1020_v49  ;;  %v961_v58 = vor.u32 %v1080_v52, %v958_v53  ;;  %v948_v59 = vld [vmem:[%s1497_s23 + $0x20] sm:$0xf] }
  0x3a   : > { %563 = vmatpush.bf16.msra.mxu3 %v1041_v38  ;;  %v1079_v60 = vld [vmem:[%s1497_s23 + $0x24] sm:$0xf0]  ;;  %v1012_v61 = vld [vmem:[%s1497_s23 + $0xa0] sm:$0xf]  ;;  %v1025_v62 = vor.u32 %v1096_v54, %v1022_v55  ;;  %v1078_v0 = vld [vmem:[%s1497_s23 + $0x24] sm:$0xf] }
  0x3b   : > { %522 = vmatpush.bf16.msra.mxu0 %v965_v44  ;;  %v1095_v63 = vld [vmem:[%s1497_s23 + $0xa4] sm:$0xf0]  ;;  %v950_v1 = vld [vmem:[%s1497_s23 + $0x28] sm:$0xf0]  ;;  %v1094_v2 = vld [vmem:[%s1497_s23 + $0xa4] sm:$0xf]  ;;  %v949_v4 = vor.u32 %v1079_v60, %v948_v59 }
  0x3c   : > { %536 = vmatpush.bf16.msra.mxu1 %v1029_v45  ;;  %v1014_v3 = vld [vmem:[%s1497_s23 + $0xa8] sm:$0xf0]  ;;  %v1013_v5 = vor.u32 %v1095_v63, %v1012_v61  ;;  %v953_v6 = vor.u32 %v1078_v0, %v950_v1  ;;  %v940_v7 = vld [vmem:[%s1497_s23 + $0x10] sm:$0xf]  ;;  %v1077_v8 = vld [vmem:[%s1497_s23 + $0x14] sm:$0xf0]  ;;  %v663_v1 = vlaneseq (%p598_p13) }
  0x3d   : > { %550 = vmatpush.bf16.msra.mxu2 %v969_v46  ;;  %v1004_v9 = vld [vmem:[%s1497_s23 + $0x90] sm:$0xf]  ;;  %v1017_v10 = vor.u32 %v1094_v2, %v1014_v3  ;;  %v1093_v11 = vld [vmem:[%s1497_s23 + $0x94] sm:$0xf0]  ;;  %v1076_v12 = vld [vmem:[%s1497_s23 + $0x14] sm:$0xf]  ;;  %v941_v16 = vor.u32 %v1077_v8, %v940_v7 }
  0x3e   : > { %564 = vmatpush.bf16.msra.mxu3 %v1033_v50  ;;  %v942_v13 = vld [vmem:[%s1497_s23 + $0x18] sm:$0xf0]  ;;  %v1092_v14 = vld [vmem:[%s1497_s23 + $0x94] sm:$0xf]  ;;  %v1005_v17 = vor.u32 %v1093_v11, %v1004_v9  ;;  %v932_v19 = vld [vmem:[%s1497_s23] sm:$0xf] }
  0x3f   : > { %523 = vmatpush.bf16.msra.mxu0 %v957_v56  ;;  %v1006_v15 = vld [vmem:[%s1497_s23 + $0x98] sm:$0xf0]  ;;  %v945_v18 = vor.u32 %v1076_v12, %v942_v13  ;;  %v1075_v20 = vld [vmem:[%s1497_s23 + $0x4] sm:$0xf0]  ;;  %v996_v21 = vld [vmem:[%s1497_s23 + $0x80] sm:$0xf] }
  0x40   : > { %537 = vmatpush.bf16.msra.mxu1 %v1021_v57  ;;  %v1009_v22 = vor.u32 %v1092_v14, %v1006_v15  ;;  %v1091_v23 = vld [vmem:[%s1497_s23 + $0x84] sm:$0xf0]  ;;  %v1074_v24 = vld [vmem:[%s1497_s23 + $0x4] sm:$0xf]  ;;  %v934_v25 = vld [vmem:[%s1497_s23 + $0x8] sm:$0xf0]  ;;  %v933_v28 = vor.u32 %v1075_v20, %v932_v19 }
  0x41   : > { %551 = vmatpush.bf16.msra.mxu2 %v961_v58  ;;  %v1090_v26 = vld [vmem:[%s1497_s23 + $0x84] sm:$0xf]  ;;  %v998_v27 = vld [vmem:[%s1497_s23 + $0x88] sm:$0xf0]  ;;  %v924_v29 = vld [vmem:[%s1489_s1] sm:$0xf]  ;;  %v997_v31 = vor.u32 %v1091_v23, %v996_v21  ;;  %v937_v32 = vor.u32 %v1074_v24, %v934_v25 }
  0x42   : > { %565 = vmatpush.bf16.msra.mxu3 %v1025_v62  ;;  %v1073_v30 = vld [vmem:[%s1489_s1 + $0x4] sm:$0xf0]  ;;  %v1072_v33 = vld [vmem:[%s1489_s1 + $0x4] sm:$0xf]  ;;  %v926_v34 = vld [vmem:[%s1489_s1 + $0x8] sm:$0xf0]  ;;  %v1001_v35 = vor.u32 %v1090_v26, %v998_v27 }
  0x43   : > { %524 = vmatpush.bf16.msra.mxu0 %v949_v4  ;;  %v925_v36 = vor.u32 %v1073_v30, %v924_v29  ;;  %v929_v37 = vor.u32 %v1072_v33, %v926_v34  ;;  %s921_s22 = sshll.u32 %s1485_s24, 1  ;;  %s1106_s8 = sshll.u32 %s1361_s15, 5  ;;  %v664_v2 = vand.u32 (%p598_p13), 127, %v663_v1  ;;  %vm668_vm1 = vcmask (%p598_p13), 130048  }
  0x44   : > { %538 = vmatpush.bf16.msra.mxu1 %v1013_v5  ;;  %s264_s25 = scalar_lea.vmem [#allocation9], %s921_s22  ;;  %s593_s11 = scalar_lea.vmem [#allocation3], %s1106_s8 }
  0x45   : > { %552 = vmatpush.bf16.msra.mxu2 %v953_v6  ;;  %v301_v38 = vld [vmem:[%s264_s25] sm:$0x3]  ;;  %vm665_vm0 = vcmp.lt.s32.totalorder (%p598_p13), %v664_v2, 2 }
  0x46   : > { %566 = vmatpush.bf16.msra.mxu3 %v1017_v10  ;;  %v303_v40 = vperm.slane %v301_v38, 0  ;;  %v304_v45 = vperm.slane %v301_v38, 1 }
  0x47   : > { %525 = vmatpush.bf16.msra.mxu0 %v941_v16 }
  0x48   : > { %539 = vmatpush.bf16.msra.mxu1 %v1005_v17 }
  0x49   : > { %553 = vmatpush.bf16.msra.mxu2 %v945_v18 }
  0x4a   : > { %567 = vmatpush.bf16.msra.mxu3 %v1009_v22 }
  0x4b   : > { %526 = vmatpush.bf16.msra.mxu0 %v933_v28 }
  0x4c   : > { %540 = vmatpush.bf16.msra.mxu1 %v997_v31 }
  0x4d   : > { %554 = vmatpush.bf16.msra.mxu2 %v937_v32 }
  0x4e   : > { %568 = vmatpush.bf16.msra.mxu3 %v1001_v35  ;;  %527 = vmatmul.bf16.vlgmr.msra.gmra.mxu0 %v925_v36 }
  0x4f   : > { %541 = vmatmul.bf16.vlgmr.msra.gmra.mxu1 %v929_v37 }
  0x50   : > { %555 = vmatmul.bf16.vlgmr.msra.gmra.mxu2 %v925_v36 }
  0x51   : > { %569 = vmatmul.bf16.vlgmr.msra.gmra.mxu3 %v929_v37 }
  0xcb   : > { %v528_v39 = vpop.f32.mrf.mxu0 }
  0xcc   : > { %v542_v41 = vpop.f32.mrf.mxu1 }
  0xcd   : > { %v543_v42 = vadd.f32 %v542_v41, %v528_v39 }
  0xcf   : > { %v575_v43 = vadd.f32 %v543_v42, %v303_v40 }
  0xd1   : > { %594 = vst [vmem:[%s593_s11] sm:$0xff] %v575_v43 }
  0xd3   : > { %v556_v44 = vpop.f32.mrf.mxu2  ;;  %v530_v47 = vpop.f32.mrf.mxu0 }
  0xd4   : > { %v570_v46 = vpop.f32.mrf.mxu3  ;;  %v544_v49 = vpop.f32.mrf.mxu1 }
  0xd5   : > { %v571_v48 = vadd.f32 %v570_v46, %v556_v44  ;;  %v545_v50 = vadd.f32 %v544_v49, %v530_v47 }
  0xd7   : > { %v576_v51 = vadd.f32 %v571_v48, %v304_v45  ;;  %v577_v52 = vadd.f32 %v545_v50, %v303_v40 }
  0xd9   : > { %595 = vst [vmem:[%s593_s11 + $0x8] sm:$0xff] %v576_v51 }
  0xda   : > { %596 = vst [vmem:[%s593_s11 + $0x10] sm:$0xff] %v577_v52 }
  0xdb   : > { %v558_v53 = vpop.f32.mrf.mxu2 }
  0xdc   : > { %v572_v54 = vpop.f32.mrf.mxu3 }
  0xdd   : > { %v573_v55 = vadd.f32 %v572_v54, %v558_v53  ;;  %605 = sbr.rel (!%p598_p13) target bundleno = 777 (0x309), region = 56 }
  0xdf   : > { %v578_v56 = vadd.f32 %v573_v55, %v304_v45 }
  0xe1   : > { %597 = vst [vmem:[%s593_s11 + $0x18] sm:$0xff] %v578_v56 }
  0xe8   : > { %v613_v57 = vld [vmem:[#allocation3 + $0x30] sm:$0xff]  ;;  %v614_v58 = vld [vmem:[#allocation3 + $0x38] sm:$0xff]  ;;  %v611_v59 = vld [vmem:[#allocation3 + $0x20] sm:$0xff] }
  0xe9   : > { %629 = vmatpush.xpose.msra.mxu0 %v613_v57  ;;  %652 = vmatpush.xpose.msra.mxu1 %v614_v58  ;;  %v612_v60 = vld [vmem:[#allocation3 + $0x28] sm:$0xff]  ;;  %v606_v61 = vld [vmem:[#allocation3] sm:$0xff]  ;;  %v608_v63 = vld [vmem:[#allocation3 + $0x10] sm:$0xff] }
  0xea   : > { %v607_v62 = vld [vmem:[#allocation3 + $0x8] sm:$0xff]  ;;  %v609_v0 = vld [vmem:[#allocation3 + $0x18] sm:$0xff]  ;;  %v720_v25 = vld [vmem:[#allocation3 + $0x50] sm:$0xff] }
  0xeb   : > { %v721_v26 = vld [vmem:[#allocation3 + $0x58] sm:$0xff]  ;;  %742 = vmatpush.msra.mxu2 %v720_v25  ;;  %v718_v27 = vld [vmem:[#allocation3 + $0x40] sm:$0xff]  ;;  %v719_v28 = vld [vmem:[#allocation3 + $0x48] sm:$0xff] }
  0xec   : > { %765 = vmatpush.msra.mxu3 %v721_v26 }
  0xed   : > { %630 = vmatpush.xpose.msra.mxu0 %v611_v59  ;;  %653 = vmatpush.xpose.msra.mxu1 %v612_v60 }
  0xee   : > { %743 = vmatpush.msra.mxu2 %v718_v27  ;;  %766 = vmatpush.msra.mxu3 %v719_v28 }
  0xf0   : > { %631 = vmatmul.f32.vlgmr.msra.gmra.mxu0 %v606_v61  ;;  %654 = vmatmul.f32.vlgmr.msra.gmra.mxu1 %v607_v62 }
  0xf8   : > { %634 = vmatmul.f32.gmra.mxu0 %v608_v63  ;;  %657 = vmatmul.f32.gmra.mxu1 %v609_v0 }
 0x16d   : > { %v632_v3 = vpop.f32.mrf.mxu0  ;;  %v655_v4 = vpop.f32.mrf.mxu1 }
 0x16e   : > { %v656_v5 = vadd.f32 %v655_v4, %v632_v3 }
 0x170   : > { %v661_v6 = vmul.f32 16.0, %v656_v5 }
 0x172   : > { %v666_v7 = vsel %vm665_vm0, %v661_v6, -inf }
 0x173   : > { %v669_v8 = vsel %vm668_vm1, %v666_v7, -inf }
 0x174   : > { %670 = vmax.xlane.f32.xlu0 %v669_v8 }
 0x175   : > { %v635_v9 = vpop.f32.mrf.mxu0  ;;  %v658_v10 = vpop.f32.mrf.mxu1 }
 0x176   : > { %v659_v11 = vadd.f32 %v658_v10, %v635_v9 }
 0x178   : > { %v662_v12 = vmul.f32 16.0, %v659_v11 }
 0x17a   : > { %v667_v13 = vsel %vm665_vm0, %v662_v12, -inf }
 0x17b   : > { %v672_v14 = vsel %vm668_vm1, %v667_v13, -inf }
 0x17c   : > { %673 = vmax.xlane.f32.xlu0 %v672_v14 }
 0x1e7   : > { %v671_v15 = vpop.xlane.xlu0 %670 }
 0x1e8   : > { %v675_v16 = vsub.f32 %v666_v7, %v671_v15 }
 0x1ea   : > { %v677_v17 = vmul.f32 1.442695, %v675_v16 }
 0x1ec   : > { %1185 = vpow2.f32 %v677_v17 }
 0x1ef   : > { %v674_v18 = vpop.xlane.xlu0 %673 }
 0x1f0   : > { %v676_v19 = vsub.f32 %v667_v13, %v674_v18 }
 0x1f2   : > { %v1186_v20 = vpop.eup %1185  ;;  %v679_v21 = vmul.f32 1.442695, %v676_v19 }
 0x1f3   : > { %v681_v22 = vsel %vm668_vm1, %v1186_v20, 0.0 }
 0x1f4   : > { %1187 = vpow2.f32 %v679_v21  ;;  %682 = vadd.xlane.f32.xlu1 %v681_v22 }
 0x1fa   : > { %v1188_v23 = vpop.eup %1187 }
 0x1fb   : > { %v684_v24 = vsel %vm668_vm1, %v1188_v23, 0.0 }
 0x1fc   : > { %685 = vadd.xlane.f32.xlu1 %v684_v24 }
 0x267   : > { %v683_v29 = vpop.xlane.xlu1 %682 }
 0x268   : > { %1189 = vrcp.f32 %v683_v29  ;;  %v698_v34 = vand.u32 2147483648, %v683_v29  ;;  %v696_v36 = vand.u32 2147483647, %v683_v29  ;;  %vm692_vm3 = vweird.f32 %v683_v29 }
 0x26a   : > { %v699_v39 = vor.u32 1.1754944e-38, %v698_v34  ;;  %vm697_vm5 = vcmp.eq.f32.partialorder %v696_v36, 8.507059e+37 }
 0x26e   : > { %v1190_v30 = vpop.eup %1189 }
 0x26f   : > { %v688_v31 = vmul.f32 %v1190_v30, %v683_v29  ;;  %v686_v32 = vpop.xlane.xlu1 %685  ;;  %vm693_vm2 = vweird.f32 %v1190_v30 }
 0x270   : > { %1191 = vrcp.f32 %v686_v32  ;;  %vm694_vm4 = vmor %vm692_vm3, %vm693_vm2  ;;  %v712_v45 = vand.u32 2147483648, %v686_v32  ;;  %v710_v47 = vand.u32 2147483647, %v686_v32  ;;  %vm706_vm7 = vweird.f32 %v686_v32 }
 0x271   : > { %v689_v33 = vsub.f32 1.0, %v688_v31 }
 0x272   : > { %v713_v49 = vor.u32 1.1754944e-38, %v712_v45  ;;  %vm711_vm9 = vcmp.eq.f32.partialorder %v710_v47, 8.507059e+37 }
 0x273   : > { %v690_v35 = vmul.f32 %v1190_v30, %v689_v33 }
 0x275   : > { %v691_v37 = vadd.f32 %v1190_v30, %v690_v35 }
 0x276   : > { %v1192_v38 = vpop.eup %1191 }
 0x277   : > { %v702_v40 = vmul.f32 %v1192_v38, %v686_v32  ;;  %v695_v41 = vsel %vm694_vm4, %v1190_v30, %v691_v37  ;;  %vm707_vm6 = vweird.f32 %v1192_v38 }
 0x278   : > { %v700_v42 = vsel %vm697_vm5, %v699_v39, %v695_v41  ;;  %vm708_vm8 = vmor %vm706_vm7, %vm707_vm6 }
 0x279   : > { %v703_v43 = vsub.f32 1.0, %v702_v40  ;;  %v715_v44 = vmul.f32 %v1186_v20, %v700_v42 }
 0x27b   : > { %v704_v46 = vmul.f32 %v1192_v38, %v703_v43  ;;  %1062 = vmatmul.msk.f32.vlgmr.msra.gmra.mxu2 %vm668_vm1, %v715_v44  ;;  %1064 = vmatmul.msk.f32.vlgmr.msra.gmra.mxu3 %vm668_vm1, %v715_v44 }
 0x27d   : > { %v705_v48 = vadd.f32 %v1192_v38, %v704_v46 }
 0x27f   : > { %v709_v50 = vsel %vm708_vm8, %v1192_v38, %v705_v48 }
 0x280   : > { %v714_v51 = vsel %vm711_vm9, %v713_v49, %v709_v50 }
 0x281   : > { %v716_v52 = vmul.f32 %v1188_v23, %v714_v51 }
 0x283   : > { %1063 = vmatmul.msk.f32.gmra.mxu2 %vm668_vm1, %v716_v52  ;;  %1065 = vmatmul.msk.f32.gmra.mxu3 %vm668_vm1, %v716_v52 }
 0x2fe   : > { %v745_v53 = vpop.f32.mrf.mxu2  ;;  %v768_v54 = vpop.f32.mrf.mxu3 }
 0x2ff   : > { %774 = vst [vmem:[#allocation10] sm:$0xff] %v745_v53 }
 0x300   : > { %775 = vst [vmem:[#allocation10 + $0x8] sm:$0xff] %v768_v54 }
 0x306   : > { %v748_v55 = vpop.f32.mrf.mxu2  ;;  %v771_v56 = vpop.f32.mrf.mxu3 }
 0x307   : > { %776 = vst [vmem:[#allocation10 + $0x10] sm:$0xff] %v748_v55 }
 0x308   : > { %777 = vst [vmem:[#allocation10 + $0x18] sm:$0xff] %v771_v56 }
 0x309 PF: > { %p1130_p0 = scmp.eq.s32.totalorder %s1425_s18, 2  ;;  %s785_s20 = sshll.u32 %s1609_s3, 4  ;;  %s786_s20 = int_to_ptr.hbm [resolvable:$true] %s785_s20 }
 0x30a   : > { %s1373_s21 = smov [#allocation10]   ;;  %s1374_s28 = smov 256  }
 0x30b   : > { %s783_s27 = sshll.u32 %s1373_s21, 4  ;;  %s1375_s29 = smov 16   ;;  %s784_s27 = int_to_ptr.vmem [resolvable:$true] %s783_s27 }
 0x30c   : > { %1116 = dma.vmem_to_hbm [thread:$0]  (%p1130_p0), %s784_s27, 512, %s786_s20, [#allocation6], %s1374_s28, %s1374_s28, %s1375_s29  }
 0x30d   : > { %1344 = dma.done.wait (%p1130_p0), [#allocation6], 512  }
 0x30e   : > { %1346 = vsyncadd (%p1130_p0), [#allocation6], 4294966784 }
 0x30f PF: > { %s1622_s26 = sld [smem:[#allocation15_spill]]  ;;  %s1626_s12 = smov %s1353_s13 }
 0x310   : > { %s1623_s30 = sld [smem:[#allocation14_spill]]  ;;  %s1628_s15 = smov %s1365_s16 }
 0x311   : > { %s1624_s14 = sld [smem:[#allocation17_spill]] }
 0x312   : > { %s1625_s18 = sld [smem:[#allocation16_spill]] }
 0x315   : > { %s20_s17 = sadd.s32 1, %s1622_s26  }
 0x316   : > { %p17_p1 = scmp.ge.s32.totalorder %s20_s17, 5   ;;  %s1627_s13 = smov %s1623_s30 }
 0x318   : > { %s1629_s16 = smov %s1625_s18  ;;  %19 = sbr.rel (!%p17_p1) target bundleno = 9 (0x9), region = 108 }
 0x31d   :  { %802 = vsyncpa [#allocation5], 1 }
 0x31e   :  { %804 = vsyncpa [#allocation5 + $0x1], 1 }
 0x31f   :  { %805 = vsyncpa [#allocation8], 1 }
 0x320   :  { %807 = vsyncpa [#allocation8 + $0x1], 1 }
 0x321   :  { %808 = vsyncpa [#allocation6], 1 }
 0x322   :  { %810 = vsyncpa [#allocation6 + $0x1], 1 }

</bundles_post_ra>
